<compile_context>
chip_gen: v7x
topology: tpu7x:2x2x1
jax: 0.10.0
libtpu: 0.0.40
codegen_flags: <defaults>
</compile_context>

<pallas_src>
import jax
import jax.numpy as jnp
from jax.experimental import pallas as pl
from jax.experimental.pallas import tpu as pltpu

_HP = jax.lax.Precision.HIGHEST


# ----------------------------- Pallas kernel ------------------------------ #
def _cond_gaussian_kernel(
    data_ref,     # [TB, data_dim]   un-normalized data (norm folded into w1/b1)
    design_ref,   # [TB, context]    un-normalized flattened design
    w1d_ref,      # [data_dim, H]    first-layer weights for the data columns
    w1x_ref,      # [context,  H]    first-layer weights for the design columns
    b1_ref,       # [1, H]
    w2_ref,       # [H, H]
    b2_ref,       # [1, H]
    w3_ref,       # [H, 2F]          output affine folded into mu-columns
    b3_ref,       # [1, 2F]          mu bias affine-folded, sigma bias += log(model_std)
    out_ref,      # [TB, 2F]         out[:, :F] = mu, out[:, F:] = sigma
):
    F = out_ref.shape[-1] // 2

    # Layer 1 as split-K matmul (replaces the HBM concat of [data, design]).
    h = jnp.dot(data_ref[...], w1d_ref[...],
                preferred_element_type=jnp.float32, precision=_HP)
    h = h + jnp.dot(design_ref[...], w1x_ref[...],
                    preferred_element_type=jnp.float32, precision=_HP)
    h = jnp.maximum(h + b1_ref[...], 0.0)

    # Layer 2.
    h = jnp.maximum(
        jnp.dot(h, w2_ref[...], preferred_element_type=jnp.float32, precision=_HP)
        + b2_ref[...],
        0.0,
    )

    # Layer 3 (affine + log(model_std) already folded into w3/b3).
    y = jnp.dot(h, w3_ref[...], preferred_element_type=jnp.float32, precision=_HP)
    y = y + b3_ref[...]

    # mu lanes [0, F) pass through; sigma lanes [F, 2F) get exp.  The lane-iota
    # select avoids a cross-lane extract of y[:, F:] at a non-aligned offset and
    # lets us emit one lane-contiguous output slab (single writeback stream).
    lane = jax.lax.broadcasted_iota(jnp.int32, y.shape, 1)
    out_ref[...] = jnp.where(lane < F, y, jnp.exp(y)).astype(out_ref.dtype)


# --------------------- one-time parameter folding -------------------------- #
def fold_params(params):
    """Fold normalization / output affine into the MLP parameters (call once)."""
    data_dim = params["data_mean"].shape[-1]
    F = params["model_mean"].shape[-1]

    w1 = params["w1"].astype(jnp.float32)
    b1 = params["b1"].astype(jnp.float32)
    w1d, w1x = w1[:data_dim], w1[data_dim:]
    d_scale = 1.0 / params["data_std"]
    x_scale = 1.0 / params["design_std"]
    w1d_f = w1d * d_scale[:, None]
    w1x_f = w1x * x_scale[:, None]
    b1_f = (
        b1
        - jnp.dot(params["data_mean"] * d_scale, w1d, precision=_HP)
        - jnp.dot(params["design_mean"] * x_scale, w1x, precision=_HP)
    )

    w3 = params["w3"].astype(jnp.float32)
    b3 = params["b3"].astype(jnp.float32)
    mstd, mmean = params["model_std"], params["model_mean"]
    w3_f = jnp.concatenate([w3[:, :F] * mstd, w3[:, F:]], axis=-1)
    b3_f = jnp.concatenate(
        [b3[:F] * mstd + mmean, b3[F:] + jnp.log(mstd)], axis=-1
    )

    return {
        "w1d": w1d_f,
        "w1x": w1x_f,
        "b1": b1_f[None, :],
        "w2": params["w2"].astype(jnp.float32),
        "b2": params["b2"].astype(jnp.float32)[None, :],
        "w3": w3_f,
        "b3": b3_f[None, :],
        "features": F,
    }


# ------------------------------ JAX wrapper -------------------------------- #
def conditional_gaussian_forward(data, design, folded, *, batch_tile=512):
    """Returns (mu, sigma) of Independent(Normal(mu, sigma), 1).

    data:   [B, N_rec*2]
    design: [B, r, c]  with r*c == context == (N_rec-1)*N_rec//2
    """
    design_flat = design.reshape(design.shape[:-2] + (-1,))
    B, data_dim = data.shape
    ctx = design_flat.shape[-1]
    H = folded["w2"].shape[0]
    F = folded["features"]

    # Batch tiling: single tile when B is small; otherwise large (>=512-row)
    # tiles so per-grid-step overhead is amortized while staying far below the
    # v7x 64 MiB VMEM budget even with double-buffering.
    TB = B if B <= batch_tile else batch_tile
    num_tiles = pl.cdiv(B, TB)
    B_pad = num_tiles * TB
    if B_pad != B:
        data = jnp.pad(data, ((0, B_pad - B), (0, 0)))
        design_flat = jnp.pad(design_flat, ((0, B_pad - B), (0, 0)))

    row = lambda i: (i, 0)   # batch-tiled operands
    rep = lambda i: (0, 0)   # weights/biases resident in VMEM across the grid

    out = pl.pallas_call(
        _cond_gaussian_kernel,
        out_shape=jax.ShapeDtypeStruct((B_pad, 2 * F), jnp.float32),
        grid_spec=pltpu.PrefetchScalarGridSpec(
            num_scalar_prefetch=0,
            grid=(num_tiles,),
            in_specs=[
                pl.BlockSpec((TB, data_dim), row),
                pl.BlockSpec((TB, ctx), row),
                pl.BlockSpec((data_dim, H), rep),
                pl.BlockSpec((ctx, H), rep),
                pl.BlockSpec((1, H), rep),
                pl.BlockSpec((H, H), rep),
                pl.BlockSpec((1, H), rep),
                pl.BlockSpec((H, 2 * F), rep),
                pl.BlockSpec((1, 2 * F), rep),
            ],
            out_specs=pl.BlockSpec((TB, 2 * F), row),
        ),
        compiler_params=pltpu.CompilerParams(
            dimension_semantics=("parallel",),
        ),
    )(
        data,
        design_flat,
        folded["w1d"],
        folded["w1x"],
        folded["b1"],
        folded["w2"],
        folded["b2"],
        folded["w3"],
        folded["b3"],
    )

    out = out[:B]
    # TODO(synk): torch.distributions.Independent(Normal(mu, sigma), 1) object
    # construction has no Pallas equivalent; (mu, sigma) fully parameterize it.
    return out[:, :F], out[:, F:]


# -------------------------- pure-JAX reference ----------------------------- #
def _reference(data, design, params):
    design_flat = design.reshape(design.shape[:-2] + (-1,))
    nmean = jnp.concatenate([params["data_mean"], params["design_mean"]], axis=-1)
    nstd = jnp.concatenate([params["data_std"], params["design_std"]], axis=-1)
    x = jnp.concatenate([data, design_flat], axis=-1)
    x = (x - nmean) / nstd
    h = jnp.maximum(jnp.dot(x, params["w1"], precision=_HP) + params["b1"], 0.0)
    h = jnp.maximum(jnp.dot(h, params["w2"], precision=_HP) + params["b2"], 0.0)
    y = jnp.dot(h, params["w3"], precision=_HP) + params["b3"]
    F = params["model_mean"].shape[-1]
    mu, log_sigma = y[:, :F], y[:, F:]
    mu = mu * params["model_std"] + params["model_mean"]
    log_sigma = log_sigma + jnp.log(params["model_std"])
    return mu, jnp.exp(log_sigma)


# --------------------------------- main ------------------------------------ #
if __name__ == "__main__":
    # Module hyper-parameters (small, consistent with the PyTorch __init__).
    N_rec = 4
    context = (N_rec - 1) * N_rec // 2          # 6
    data_dim = N_rec * 2                        # 8
    features = 5
    hidden = 32
    B = 8

    key = jax.random.PRNGKey(0)
    keys = jax.random.split(key, 12)

    params = {
        "w1": jax.random.normal(keys[0], (data_dim + context, hidden), jnp.float32) * 0.2,
        "b1": jax.random.normal(keys[1], (hidden,), jnp.float32) * 0.1,
        "w2": jax.random.normal(keys[2], (hidden, hidden), jnp.float32) * 0.2,
        "b2": jax.random.normal(keys[3], (hidden,), jnp.float32) * 0.1,
        "w3": jax.random.normal(keys[4], (hidden, 2 * features), jnp.float32) * 0.2,
        "b3": jax.random.normal(keys[5], (2 * features,), jnp.float32) * 0.1,
        "data_mean": jax.random.normal(keys[6], (data_dim,), jnp.float32) * 0.3,
        "data_std": 0.5 + jax.random.uniform(keys[7], (data_dim,), jnp.float32),
        "design_mean": jax.random.normal(keys[8], (context,), jnp.float32) * 0.3,
        "design_std": 0.5 + jax.random.uniform(keys[9], (context,), jnp.float32),
        "model_mean": jax.random.normal(keys[10], (features,), jnp.float32) * 0.3,
        "model_std": 0.5 + jax.random.uniform(keys[11], (features,), jnp.float32),
    }

    dkey1, dkey2 = jax.random.split(jax.random.PRNGKey(42))
    data = jax.random.normal(dkey1, (B, data_dim), jnp.float32)
    design = jax.random.normal(dkey2, (B, 3, 2), jnp.float32)   # flattens to context=6

    folded = fold_params(params)                 # one-time parameter folding
    mu, sigma = conditional_gaussian_forward(data, design, folded)
    mu = jax.block_until_ready(mu)
    sigma = jax.block_until_ready(sigma)

    mu_ref, sigma_ref = _reference(data, design, params)
    assert jnp.allclose(mu, mu_ref, atol=1e-4, rtol=1e-4), "mu mismatch"
    assert jnp.allclose(sigma, sigma_ref, atol=1e-4, rtol=1e-4), "sigma mismatch"

    print("KERNEL_OK")
</pallas_src>

<mosaic_0001>
module attributes {stable_mosaic.version = 11 : i64} {
  func.func @_cond_gaussian_kernel(%arg0: i32, %arg1: memref<8x8xf32, #tpu.memory_space<vmem>>, %arg2: memref<8x6xf32, #tpu.memory_space<vmem>>, %arg3: memref<8x32xf32, #tpu.memory_space<vmem>>, %arg4: memref<6x32xf32, #tpu.memory_space<vmem>>, %arg5: memref<1x32xf32, #tpu.memory_space<vmem>>, %arg6: memref<32x32xf32, #tpu.memory_space<vmem>>, %arg7: memref<1x32xf32, #tpu.memory_space<vmem>>, %arg8: memref<32x10xf32, #tpu.memory_space<vmem>>, %arg9: memref<1x10xf32, #tpu.memory_space<vmem>>, %arg10: memref<8x10xf32, #tpu.memory_space<vmem>>) attributes {dimension_semantics = [#tpu.dimension_semantics<parallel>], iteration_bounds = array<i64: 1>, scalar_prefetch = 0 : i64, scratch_operands = 0 : i64, tpu.core_type = #tpu.core_type<tc>, window_params = [{transform_indices = @transform_0, window_bounds = array<i64: 8, 8>}, {transform_indices = @transform_1, window_bounds = array<i64: 8, 6>}, {pipeline_mode = #tpu.pipeline_mode<synchronous>, transform_indices = @transform_2, window_bounds = array<i64: 8, 32>}, {pipeline_mode = #tpu.pipeline_mode<synchronous>, transform_indices = @transform_3, window_bounds = array<i64: 6, 32>}, {pipeline_mode = #tpu.pipeline_mode<synchronous>, transform_indices = @transform_4, window_bounds = array<i64: 1, 32>}, {pipeline_mode = #tpu.pipeline_mode<synchronous>, transform_indices = @transform_5, window_bounds = array<i64: 32, 32>}, {pipeline_mode = #tpu.pipeline_mode<synchronous>, transform_indices = @transform_6, window_bounds = array<i64: 1, 32>}, {pipeline_mode = #tpu.pipeline_mode<synchronous>, transform_indices = @transform_7, window_bounds = array<i64: 32, 10>}, {pipeline_mode = #tpu.pipeline_mode<synchronous>, transform_indices = @transform_8, window_bounds = array<i64: 1, 10>}, {transform_indices = @transform_9, window_bounds = array<i64: 8, 10>}]} {
    %c0 = arith.constant 0 : index
    %c0_0 = arith.constant 0 : index
    %0 = vector.load %arg1[%c0, %c0_0] : memref<8x8xf32, #tpu.memory_space<vmem>>, vector<8x8xf32>
    %c0_1 = arith.constant 0 : index
    %c0_2 = arith.constant 0 : index
    %1 = vector.load %arg3[%c0_1, %c0_2] : memref<8x32xf32, #tpu.memory_space<vmem>>, vector<8x32xf32>
    %cst = arith.constant dense<0.000000e+00> : vector<8x32xf32>
    %2 = tpu.matmul %0, %1, %cst {dimension_numbers = #tpu.dot_dimension_numbers<[1], [0], [0], [1], [0, 0, 1, 1], [], []>, precision = #tpu.contract_precision<fp32>} : vector<8x8xf32>, vector<8x32xf32>, vector<8x32xf32> -> vector<8x32xf32>
    %c0_3 = arith.constant 0 : index
    %c0_4 = arith.constant 0 : index
    %3 = vector.load %arg2[%c0_3, %c0_4] : memref<8x6xf32, #tpu.memory_space<vmem>>, vector<8x6xf32>
    %c0_5 = arith.constant 0 : index
    %c0_6 = arith.constant 0 : index
    %4 = vector.load %arg4[%c0_5, %c0_6] : memref<6x32xf32, #tpu.memory_space<vmem>>, vector<6x32xf32>
    %cst_7 = arith.constant dense<0.000000e+00> : vector<8x32xf32>
    %5 = tpu.matmul %3, %4, %cst_7 {dimension_numbers = #tpu.dot_dimension_numbers<[1], [0], [0], [1], [0, 0, 1, 1], [], []>, precision = #tpu.contract_precision<fp32>} : vector<8x6xf32>, vector<6x32xf32>, vector<8x32xf32> -> vector<8x32xf32>
    %6 = arith.addf %2, %5 : vector<8x32xf32>
    %c0_8 = arith.constant 0 : index
    %c0_9 = arith.constant 0 : index
    %7 = vector.load %arg5[%c0_8, %c0_9] : memref<1x32xf32, #tpu.memory_space<vmem>>, vector<1x32xf32>
    %8 = vector.broadcast %7 : vector<1x32xf32> to vector<8x32xf32>
    %9 = arith.addf %6, %8 : vector<8x32xf32>
    %cst_10 = arith.constant 0.000000e+00 : f32
    %10 = vector.broadcast %cst_10 : f32 to vector<8x32xf32>
    %11 = arith.maximumf %9, %10 : vector<8x32xf32>
    %c0_11 = arith.constant 0 : index
    %c0_12 = arith.constant 0 : index
    %12 = vector.load %arg6[%c0_11, %c0_12] : memref<32x32xf32, #tpu.memory_space<vmem>>, vector<32x32xf32>
    %cst_13 = arith.constant dense<0.000000e+00> : vector<8x32xf32>
    %13 = tpu.matmul %11, %12, %cst_13 {dimension_numbers = #tpu.dot_dimension_numbers<[1], [0], [0], [1], [0, 0, 1, 1], [], []>, precision = #tpu.contract_precision<fp32>} : vector<8x32xf32>, vector<32x32xf32>, vector<8x32xf32> -> vector<8x32xf32>
    %c0_14 = arith.constant 0 : index
    %c0_15 = arith.constant 0 : index
    %14 = vector.load %arg7[%c0_14, %c0_15] : memref<1x32xf32, #tpu.memory_space<vmem>>, vector<1x32xf32>
    %15 = vector.broadcast %14 : vector<1x32xf32> to vector<8x32xf32>
    %16 = arith.addf %13, %15 : vector<8x32xf32>
    %cst_16 = arith.constant 0.000000e+00 : f32
    %17 = vector.broadcast %cst_16 : f32 to vector<8x32xf32>
    %18 = arith.maximumf %16, %17 : vector<8x32xf32>
    %c0_17 = arith.constant 0 : index
    %c0_18 = arith.constant 0 : index
    %19 = vector.load %arg8[%c0_17, %c0_18] : memref<32x10xf32, #tpu.memory_space<vmem>>, vector<32x10xf32>
    %cst_19 = arith.constant dense<0.000000e+00> : vector<8x10xf32>
    %20 = tpu.matmul %18, %19, %cst_19 {dimension_numbers = #tpu.dot_dimension_numbers<[1], [0], [0], [1], [0, 0, 1, 1], [], []>, precision = #tpu.contract_precision<fp32>} : vector<8x32xf32>, vector<32x10xf32>, vector<8x10xf32> -> vector<8x10xf32>
    %c0_20 = arith.constant 0 : index
    %c0_21 = arith.constant 0 : index
    %21 = vector.load %arg9[%c0_20, %c0_21] : memref<1x10xf32, #tpu.memory_space<vmem>>, vector<1x10xf32>
    %22 = vector.broadcast %21 : vector<1x10xf32> to vector<8x10xf32>
    %23 = arith.addf %20, %22 : vector<8x10xf32>
    %24 = tpu.iota {dimensions = array<i32: 1>} : vector<8x10xi32>
    %c5_i32 = arith.constant 5 : i32
    %25 = vector.broadcast %c5_i32 : i32 to vector<8x10xi32>
    %26 = arith.cmpi slt, %24, %25 : vector<8x10xi32>
    %27 = math.exp %23 : vector<8x10xf32>
    %28 = arith.select %26, %23, %27 : vector<8x10xi1>, vector<8x10xf32>
    %c0_22 = arith.constant 0 : index
    %c0_23 = arith.constant 0 : index
    %29 = vector.load %arg10[%c0_22, %c0_23] : memref<8x10xf32, #tpu.memory_space<vmem>>, vector<8x10xf32>
    tpu.vector_store %arg10[%c0_22, %c0_23], %28 {strides = array<i32>} : memref<8x10xf32, #tpu.memory_space<vmem>>, vector<8x10xf32>,
    return
  }
  func.func @transform_0(%arg0: i32) -> (i32, i32) {
    %c0_i32 = arith.constant 0 : i32
    %c0_i32_0 = arith.constant 0 : i32
    return %arg0, %c0_i32 : i32, i32
  }
  func.func @transform_1(%arg0: i32) -> (i32, i32) {
    %c0_i32 = arith.constant 0 : i32
    %c0_i32_0 = arith.constant 0 : i32
    return %arg0, %c0_i32 : i32, i32
  }
  func.func @transform_2(%arg0: i32) -> (i32, i32) {
    %c0_i32 = arith.constant 0 : i32
    %c0_i32_0 = arith.constant 0 : i32
    %c0_i32_1 = arith.constant 0 : i32
    return %c0_i32, %c0_i32_0 : i32, i32
  }
  func.func @transform_3(%arg0: i32) -> (i32, i32) {
    %c0_i32 = arith.constant 0 : i32
    %c0_i32_0 = arith.constant 0 : i32
    %c0_i32_1 = arith.constant 0 : i32
    return %c0_i32, %c0_i32_0 : i32, i32
  }
  func.func @transform_4(%arg0: i32) -> (i32, i32) {
    %c0_i32 = arith.constant 0 : i32
    %c0_i32_0 = arith.constant 0 : i32
    %c0_i32_1 = arith.constant 0 : i32
    return %c0_i32, %c0_i32_0 : i32, i32
  }
  func.func @transform_5(%arg0: i32) -> (i32, i32) {
    %c0_i32 = arith.constant 0 : i32
    %c0_i32_0 = arith.constant 0 : i32
    %c0_i32_1 = arith.constant 0 : i32
    return %c0_i32, %c0_i32_0 : i32, i32
  }
  func.func @transform_6(%arg0: i32) -> (i32, i32) {
    %c0_i32 = arith.constant 0 : i32
    %c0_i32_0 = arith.constant 0 : i32
    %c0_i32_1 = arith.constant 0 : i32
    return %c0_i32, %c0_i32_0 : i32, i32
  }
  func.func @transform_7(%arg0: i32) -> (i32, i32) {
    %c0_i32 = arith.constant 0 : i32
    %c0_i32_0 = arith.constant 0 : i32
    %c0_i32_1 = arith.constant 0 : i32
    return %c0_i32, %c0_i32_0 : i32, i32
  }
  func.func @transform_8(%arg0: i32) -> (i32, i32) {
    %c0_i32 = arith.constant 0 : i32
    %c0_i32_0 = arith.constant 0 : i32
    %c0_i32_1 = arith.constant 0 : i32
    return %c0_i32, %c0_i32_0 : i32, i32
  }
  func.func @transform_9(%arg0: i32) -> (i32, i32) {
    %c0_i32 = arith.constant 0 : i32
    %c0_i32_0 = arith.constant 0 : i32
    return %arg0, %c0_i32 : i32, i32
  }
}

</mosaic_0001>

<bundles_post_ra>
// kernel: tpu_custom_call.1
= control target key start
LH: loop header
LB: loop body
LE: loop exit
PB: predicated region body
PF: predicated region fallthrough
CT: control target
= control target key end

     0   :  { %14 = vsyncpa [#allocation3], 0  ;;  %s2661_s0 = inlined_call_operand.vmem [shape: f32[8,8], index: 0, kind: input, shape index: {}]   ;;  %s2662_s1 = inlined_call_operand.vmem [shape: f32[8,6], index: 1, kind: input, shape index: {}]   ;;  %s2663_s2 = inlined_call_operand.vmem [shape: f32[8,32], index: 2, kind: input, shape index: {}]   ;;  %s2664_s3 = inlined_call_operand.hbm [shape: f32[6,32], index: 3, kind: input, shape index: {}]   ;;  %s2665_s4 = inlined_call_operand.vmem [shape: f32[1,32], index: 4, kind: input, shape index: {}]   ;;  %s2666_s5 = inlined_call_operand.vmem [shape: f32[32,32], index: 5, kind: input, shape index: {}]   ;;  %s2667_s6 = inlined_call_operand.vmem [shape: f32[1,32], index: 6, kind: input, shape index: {}]   ;;  %s2668_s7 = inlined_call_operand.vmem [shape: f32[32,10], index: 7, kind: input, shape index: {}]   ;;  %s2669_s8 = inlined_call_operand.vmem [shape: f32[1,10], index: 8, kind: input, shape index: {}]   ;;  %s2670_s9 = inlined_call_operand.hbm [shape: f32[8,10], index: 9, kind: output, shape index: {}]  }
   0x1   :  { %15 = vsyncpa [#allocation4], 0  ;;  %s2413_s30 = smov [#allocation2]   ;;  %s2365_s13 = scalar_lea.hbm %s2664_s3, 128 }
   0x2   :  { %s28_s10 = sshll.u32 %s2413_s30, 4  ;;  %p2366_p0 = scmp.ne.s32.totalorder %s2664_s3, %s2365_s13  ;;  %s29_s10 = int_to_ptr.vmem [resolvable:$true] %s28_s10 }
   0x3   :  { %p2369_p1 = scmp.lt.u32.totalorder %s2365_s13, %s2664_s3 }
   0x5   :  { %p2371_p2 = pnand %p2369_p1, %p2366_p0 }
   0x7   :  { %2374 = shalt.err (!%p2371_p2)
}
   0x8   :  { %s2375_s18 = scalar_lea.vmem %s29_s10, 128  ;;  %p2380_p4 = scmp.lt.s32.totalorder %s29_s10, %s29_s10 }
   0x9   :  { %p2376_p3 = scmp.ne.s32.totalorder %s29_s10, %s2375_s18  ;;  %p2381_p5 = scmp.lt.s32.totalorder %s2375_s18, %s2375_s18 }
   0xb   :  { %p2382_p6 = por %p2381_p5, %p2380_p4 }
   0xd   :  { %p2383_p7 = pnand %p2382_p6, %p2376_p3 }
   0xf   :  { %2386 = shalt.err (!%p2383_p7)
}
  0x10   :  { %31 = dma.hbm_to_vmem [thread:$0]  %s2664_s3, 128, %s29_s10, [#allocation3]  }
  0x11   :  { %2409 = dma.done.wait [#allocation3], 128  }
  0x12   :  { %2410 = vsyncadd [#allocation3], 4294967168  ;;  %v2414_v0 = vmov 0.0   ;;  %vm2415_vm0 = vmmov 0   ;;  %vm53_vm1 = vcmask 1045504   ;;  %vm49_vm2 = vcmask 48128  }
  0x13   :  { %2072 = vmatprep.subr.mxu0 %v2414_v0  ;;  %2074 = vmatprep.mubr.msk.f32.mxu0 %vm2415_vm0, %v2414_v0  ;;  %vm503_vm3 = vcmask 64512   ;;  %v48_v1 = vld [vmem:[#allocation2] sm:$0x3f]  ;;  %v963_v29 = vld [vmem:[%s2666_s5 + $0x8] sm:$0xff]  ;;  %v2416_v35 = vmov 0.0|0.0   ;;  %v964_v36 = vld [vmem:[%s2666_s5 + $0x10] sm:$0xff] }
  0x14   :  { %2077 = vmatprep.subr.mxu1 %v2414_v0  ;;  %2079 = vmatprep.mubr.msk.f32.mxu1 %vm2415_vm0, %v2414_v0  ;;  %v47_v2 = vld [vmem:[%s2662_s1] sm:$0xff]  ;;  %v55_v4 = vsel %vm53_vm1, %v48_v1, 0  ;;  %v981_v31 = vand.u32 4294901760, %v963_v29  ;;  %v965_v37 = vld [vmem:[%s2666_s5 + $0x18] sm:$0xff]  ;;  %v984_v38 = vand.u32 4294901760, %v964_v36  ;;  %vm973_vm4 = vcmask 261120  }
  0x15   :  { %v46_v3 = vld [vmem:[%s2663_s2] sm:$0xff]  ;;  %v51_v5 = vsel %vm49_vm2, %v47_v2, 0  ;;  %v58_v7 = vand.u32 4294901760, %v55_v4  ;;  %v987_v39 = vand.u32 4294901760, %v965_v37  ;;  %s2417_s20 = smov [#allocation5]   ;;  %vm1968_vm6 = vcmask 80896  }
  0x16   :  { %v45_v6 = vld [vmem:[%s2661_s0] sm:$0xff]  ;;  %v123_v8 = vand.u32 4294901760, %v51_v5  ;;  %v508_v10 = vand.u32 4294901760, %v46_v3  ;;  %v2539_v34 = vsub.f32 %v963_v29, %v981_v31  ;;  %v2555_v43 = vsub.f32 %v964_v36, %v984_v38  ;;  %s1976_s21 = sshll.u32 %s2417_s20, 4  ;;  %s1977_s21 = int_to_ptr.vmem [resolvable:$true] %s1976_s21 }
  0x17   :  { %v505_v9 = vsel %vm503_vm3, %v45_v6, 0  ;;  %2073 = vmatpush3.msra.mxu0 %v58_v7  ;;  %v135_v12 = vsub.f32 %v55_v4, %v58_v7  ;;  %v962_v28 = vld [vmem:[%s2666_s5] sm:$0xff]  ;;  %v2553_v42 = vpack.c.bf16 %v987_v39, %v984_v38  ;;  %v2557_v44 = vsub.f32 %v965_v37, %v987_v39  ;;  %s2387_s3 = scalar_lea.vmem %s1977_s21, 128  ;;  %p2392_p9 = scmp.lt.s32.totalorder %s1977_s21, %s1977_s21 }
  0x18   :  { %v124_v11 = vsub.f32 %v51_v5, %v123_v8  ;;  %v573_v13 = vand.u32 4294901760, %v505_v9  ;;  %2082 = vmatprep.subr.mxu0 %v2414_v0  ;;  %v585_v16 = vsub.f32 %v46_v3, %v508_v10  ;;  %v978_v30 = vand.u32 4294901760, %v962_v28  ;;  %p2388_p8 = scmp.ne.s32.totalorder %s1977_s21, %s2387_s3  ;;  %p2393_p10 = scmp.lt.s32.totalorder %s2387_s3, %s2387_s3 }
  0x19   :  { %v136_v15 = vand.u32 4294901760, %v135_v12  ;;  %v1066_v41 = vand.u32 4294901760, %v2539_v34  ;;  %v1073_v48 = vand.u32 4294901760, %v2555_v43  ;;  %v1080_v49 = vand.u32 4294901760, %v2557_v44 }
  0x1a   :  { %v125_v14 = vand.u32 4294901760, %v124_v11  ;;  %v574_v19 = vsub.f32 %v505_v9, %v573_v13  ;;  %v586_v22 = vand.u32 4294901760, %v585_v16  ;;  %v2535_v32 = vpack.c.bf16 %v981_v31, %v978_v30  ;;  %v1985_v31 = vld [vmem:[%s2665_s4] ss:$0 sm:$0xff]  ;;  %p2394_p11 = por %p2393_p10, %p2392_p9 }
  0x1b   :  { %v137_v18 = vsub.f32 %v135_v12, %v136_v15  ;;  %v2537_v33 = vsub.f32 %v962_v28, %v978_v30  ;;  %v1067_v46 = vsub.f32 %v2539_v34, %v1066_v41  ;;  %v1074_v51 = vsub.f32 %v2555_v43, %v1073_v48 }
  0x1c   :  { %v126_v17 = vsub.f32 %v124_v11, %v125_v14  ;;  %v575_v23 = vand.u32 4294901760, %v574_v19  ;;  %v587_v24 = vsub.f32 %v585_v16, %v586_v22  ;;  %v1081_v52 = vsub.f32 %v2557_v44, %v1080_v49  ;;  %p2395_p12 = pnand %p2394_p11, %p2388_p8 }
  0x1d   :  { %v138_v21 = vand.u32 4294901760, %v137_v18  ;;  %v1059_v40 = vand.u32 4294901760, %v2537_v33  ;;  %v1068_v50 = vand.u32 4294901760, %v1067_v46  ;;  %v1075_v54 = vand.u32 4294901760, %v1074_v51  ;;  %v1464_v46 = vld [vmem:[%s2668_s7 + $0x8] sm:$0xff]  ;;  %v1465_v51 = vld [vmem:[%s2668_s7 + $0x10] sm:$0xff] }
  0x1e   :  { %v127_v20 = vand.u32 4294901760, %v126_v17  ;;  %v576_v25 = vsub.f32 %v574_v19, %v575_v23  ;;  %v588_v26 = vand.u32 4294901760, %v587_v24  ;;  %v1082_v55 = vand.u32 4294901760, %v1081_v52 }
  0x1f   :  { %2078 = vmatpush3.msra.mxu1 %v138_v21  ;;  %v1060_v45 = vsub.f32 %v2537_v33, %v1059_v40  ;;  %v2277_v57 = vpack.c.bf16 %v2539_v34, %v2537_v33  ;;  %v2280_v58 = vpack.c.bf16 %v2557_v44, %v2555_v43  ;;  %v2571_v59 = vpack.c.bf16 %v1066_v41, %v1059_v40 }
  0x20   :  { %2075 = vmatmul.mubr.f32.vlgmr.msra.gmra.mrb[0].mxu0 %v127_v20  ;;  %2080 = vmatmul.mubr.f32.vlgmr.msra.gmra.mrb[0].mxu1 %v123_v8  ;;  %v577_v27 = vand.u32 4294901760, %v576_v25  ;;  %v2274_v56 = vpack.c.bf16 %v1082_v55, %v1075_v54  ;;  %v2573_v60 = vpack.c.bf16 %v1080_v49, %v1073_v48  ;;  %v1481_v48 = vand.u32 4294901760, %v1464_v46 }
  0x21   :  { %2083 = vmatpush3.msra.mxu0 %v135_v12  ;;  %2087 = vmatprep.subr.mxu1 %v2414_v0  ;;  %v1061_v47 = vand.u32 4294901760, %v1060_v45  ;;  %v1463_v45 = vld [vmem:[%s2668_s7] sm:$0xff]  ;;  %v1484_v52 = vand.u32 4294901760, %v1465_v51 }
  0x22   :  { %2084 = vmatprep.mubr.msk.f32.mxu0 %vm2415_vm0, %v2414_v0  ;;  %2088 = vmatpush3.msra.mxu1 %v58_v7 }
  0x23   :  { %2092 = vmatprep.subr.mxu0 %v2414_v0  ;;  %2089 = vmatprep.mubr.msk.f32.mxu1 %vm2415_vm0, %v2414_v0  ;;  %v2271_v53 = vpack.c.bf16 %v1068_v50, %v1061_v47  ;;  %v1478_v47 = vand.u32 4294901760, %v1463_v45  ;;  %v1565_v50 = vsub.f32 %v1464_v46, %v1481_v48 }
  0x24   :  { %2085 = vmatmul.mubr.f32.vlgmr.msra.gmra.mrb[2].mxu0 %v124_v11  ;;  %2090 = vmatmul.mubr.f32.vlgmr.msra.gmra.mrb[2].mxu1 %v125_v14 }
  0x25   :  { %2093 = vmatpush3.msra.mxu0 %v136_v15  ;;  %2097 = vmatprep.subr.mxu1 %v2414_v0  ;;  %v2610_v49 = vpack.c.bf16 %v1481_v48, %v1478_v47  ;;  %v1566_v55 = vand.u32 4294901760, %v1565_v50 }
  0x26   :  { %2094 = vmatprep.mubr.msk.f32.mxu0 %vm2415_vm0, %v2414_v0  ;;  %2098 = vmatpush3.msra.mxu1 %v58_v7 }
  0x27   :  { %2102 = vmatprep.subr.mxu0 %v2414_v0  ;;  %2099 = vmatprep.mubr.msk.f32.mxu1 %vm2415_vm0, %v2414_v0 }
  0x28   :  { %2095 = vmatmul.mubr.f32.vlgmr.msra.gmra.mrb[4].mxu0 %v123_v8  ;;  %2100 = vmatmul.mubr.f32.vlgmr.msra.gmra.mrb[4].mxu1 %v123_v8 }
  0x29   :  { %2103 = vmatpush3.msra.mxu0 %v508_v10  ;;  %2107 = vmatprep.subr.mxu1 %v2414_v0 }
  0x2a   :  { %2104 = vmatprep.mubr.msk.f32.mxu0 %vm2415_vm0, %v2414_v0  ;;  %2108 = vmatpush3.msra.mxu1 %v588_v26 }
  0x2b   :  { %2112 = vmatprep.subr.mxu0 %v2414_v0  ;;  %2109 = vmatprep.mubr.msk.f32.mxu1 %vm2415_vm0, %v2414_v0 }
  0x2c   :  { %2105 = vmatmul.mubr.f32.vlgmr.msra.gmra.mrb[6].mxu0 %v577_v27  ;;  %2110 = vmatmul.mubr.f32.vlgmr.msra.gmra.mrb[6].mxu1 %v573_v13 }
  0x2d   :  { %2113 = vmatpush3.msra.mxu0 %v585_v16  ;;  %2117 = vmatprep.subr.mxu1 %v2414_v0 }
  0x2e   :  { %2114 = vmatprep.mubr.msk.f32.mxu0 %vm2415_vm0, %v2414_v0  ;;  %2118 = vmatpush3.msra.mxu1 %v508_v10 }
  0x2f   :  { %2122 = vmatprep.subr.mxu0 %v2414_v0  ;;  %2119 = vmatprep.mubr.msk.f32.mxu1 %vm2415_vm0, %v2414_v0 }
  0x30   :  { %2115 = vmatmul.mubr.f32.vlgmr.msra.gmra.mrb[8].mxu0 %v574_v19  ;;  %2120 = vmatmul.mubr.f32.vlgmr.msra.gmra.mrb[8].mxu1 %v575_v23 }
  0x31   :  { %2123 = vmatpush3.msra.mxu0 %v586_v22  ;;  %2127 = vmatprep.subr.mxu1 %v2414_v0 }
  0x32   :  { %2124 = vmatprep.mubr.msk.f32.mxu0 %vm2415_vm0, %v2414_v0  ;;  %2128 = vmatpush3.msra.mxu1 %v508_v10 }
  0x33   :  { %2129 = vmatprep.mubr.msk.f32.mxu1 %vm2415_vm0, %v2414_v0  ;;  %2264 = vmatprep.subr.bf16.mxu0 %v2416_v35 }
  0x34   :  { %2125 = vmatmul.mubr.f32.vlgmr.msra.gmra.mrb[10].mxu0 %v573_v13  ;;  %2130 = vmatmul.mubr.f32.vlgmr.msra.gmra.mrb[10].mxu1 %v573_v13 }
  0x35   :  { %2140 = vmatprep.mubr.msk.f32.mxu0 %vm2415_vm0, %v2414_v0  ;;  %2206 = vmatprep.mubr.msk.f32.mxu1 %vm2415_vm0, %v2414_v0 }
  0x36   :  { %2300 = vmatprep.subr.bf16.mxu1 %v2416_v35  ;;  %2266 = vmatpush3.bf16.msra.mxu0 %v2535_v32 }
  0x37   :  { %2267 = vmatprep.subr.bf16.mxu0 %v2416_v35  ;;  %2302 = vmatpush3.bf16.msra.mxu1 %v2610_v49 }
  0x38   :  { %2303 = vmatprep.subr.bf16.mxu1 %v2416_v35 }
  0x3a   :  { %2269 = vmatpush3.bf16.msra.mxu0 %v2553_v42 }
  0x3b   :  { %2270 = vmatprep.subr.bf16.mxu0 %v2416_v35 }
  0xf3   :  { %v129_v61 = vpop.f32.mrb[0].mxu0  ;;  %v205_v63 = vpop.f32.mrb[0].mxu1 }
  0xf4   :  { %v2076_v62 = vpop.f32.mrb[1].mxu0  ;;  %v206_v1 = vadd.f32 %v205_v63, %v129_v61  ;;  %v2081_v2 = vpop.f32.mrb[1].mxu1 }
  0xf7   :  { %v279_v3 = vpop.f32.mrb[2].mxu0  ;;  %v353_v6 = vpop.f32.mrb[2].mxu1 }
  0xf8   :  { %v280_v4 = vadd.f32 %v279_v3, %v206_v1  ;;  %v2086_v5 = vpop.f32.mrb[3].mxu0  ;;  %v2091_v7 = vpop.f32.mrb[3].mxu1 }
  0xfa   :  { %v354_v8 = vadd.f32 %v353_v6, %v280_v4 }
  0xfb   :  { %v427_v9 = vpop.f32.mrb[4].mxu0  ;;  %v499_v12 = vpop.f32.mrb[4].mxu1 }
  0xfc   :  { %v428_v10 = vadd.f32 %v427_v9, %v354_v8  ;;  %v2096_v11 = vpop.f32.mrb[5].mxu0  ;;  %v2101_v13 = vpop.f32.mrb[5].mxu1 }
  0xfe   :  { %v500_v14 = vadd.f32 %v499_v12, %v428_v10  ;;  %v1986_v12 = vld [vmem:[%s2667_s6] ss:$0 sm:$0xff] }
  0xff   :  { %v579_v15 = vpop.f32.mrb[6].mxu0  ;;  %v655_v18 = vpop.f32.mrb[6].mxu1 }
 0x100   :  { %v580_v16 = vadd.f32 %v579_v15, %v500_v14  ;;  %v2106_v17 = vpop.f32.mrb[7].mxu0  ;;  %v2111_v19 = vpop.f32.mrb[7].mxu1 }
 0x102   :  { %v656_v20 = vadd.f32 %v655_v18, %v580_v16 }
 0x103   :  { %v729_v21 = vpop.f32.mrb[8].mxu0  ;;  %v803_v24 = vpop.f32.mrb[8].mxu1 }
 0x104   :  { %v730_v22 = vadd.f32 %v729_v21, %v656_v20  ;;  %v2116_v23 = vpop.f32.mrb[9].mxu0  ;;  %v2121_v25 = vpop.f32.mrb[9].mxu1 }
 0x105   :  { %v1987_v23 = vld [vmem:[%s2669_s8] ss:$0 sm:$0xff] }
 0x106   :  { %v804_v26 = vadd.f32 %v803_v24, %v730_v22 }
 0x107   :  { %v877_v27 = vpop.f32.mrb[10].mxu0  ;;  %v949_v30 = vpop.f32.mrb[10].mxu1 }
 0x108   :  { %v878_v28 = vadd.f32 %v877_v27, %v804_v26  ;;  %v2126_v29 = vpop.f32.mrb[11].mxu0  ;;  %v2131_v33 = vpop.f32.mrb[11].mxu1 }
 0x10a   :  { %v950_v34 = vadd.f32 %v949_v30, %v878_v28  ;;  %v1962_v28 = vlaneseq }
 0x10c   :  { %v960_v36 = vadd.f32 %v1985_v31, %v950_v34  ;;  %v1963_v29 = vand.u32 127, %v1962_v28 }
 0x10e   :  { %v961_v37 = vmax.f32 %v960_v36, 0.0  ;;  %vm1964_vm5 = vcmp.lt.s32.totalorder %v1963_v29, 5 }
 0x110   :  { %v975_v38 = vsel %vm973_vm4, %v961_v37, 0 }
 0x111   :  { %v1046_v39 = vand.u32 4294901760, %v975_v38 }
 0x113   :  { %v1047_v40 = vsub.f32 %v975_v38, %v1046_v39 }
 0x115   :  { %v1048_v41 = vand.u32 4294901760, %v1047_v40 }
 0x117   :  { %v1049_v43 = vsub.f32 %v1047_v40, %v1048_v41 }
 0x119   :  { %v1050_v44 = vand.u32 4294901760, %v1049_v43 }
 0x11b   :  { %2141 = vmatmul.mubr.f32.vlgmr.msra.gmra.mrb[12].mxu0 %v1050_v44 }
 0x11c   :  { %2272 = vmatpush3.bf16.msra.mxu0 %v2271_v53  ;;  %2151 = vmatprep.mubr.msk.f32.mxu0 %vm2415_vm0, %v2414_v0 }
 0x11d   :  { %2273 = vmatprep.subr.bf16.mxu0 %v2416_v35 }
 0x120   :  { %2275 = vmatpush3.bf16.msra.mxu0 %v2274_v56 }
 0x121   :  { %2276 = vmatprep.subr.bf16.mxu0 %v2416_v35 }
 0x123   :  { %2152 = vmatmul.mubr.f32.vlgmr.msra.gmra.mrb[12].mxu0 %v1046_v39 }
 0x124   :  { %2278 = vmatpush3.bf16.msra.mxu0 %v2277_v57  ;;  %2162 = vmatprep.mubr.msk.f32.mxu0 %vm2415_vm0, %v2414_v0  ;;  %v1572_v57 = vsub.f32 %v1465_v51, %v1484_v52 }
 0x125   :  { %2279 = vmatprep.subr.bf16.mxu0 %v2416_v35 }
 0x126   :  { %v1573_v62 = vand.u32 4294901760, %v1572_v57 }
 0x128   :  { %2281 = vmatpush3.bf16.msra.mxu0 %v2280_v58  ;;  %v1574_v2 = vsub.f32 %v1572_v57, %v1573_v62 }
 0x129   :  { %2282 = vmatprep.subr.bf16.mxu0 %v2416_v35 }
 0x12a   :  { %v1575_v5 = vand.u32 4294901760, %v1574_v2 }
 0x12b   :  { %2163 = vmatmul.mubr.f32.vlgmr.msra.gmra.mrb[12].mxu0 %v1047_v40 }
 0x12c   :  { %2284 = vmatpush3.bf16.msra.mxu0 %v2535_v32  ;;  %2173 = vmatprep.mubr.msk.f32.mxu0 %vm2415_vm0, %v2414_v0 }
 0x12d   :  { %2285 = vmatprep.subr.bf16.mxu0 %v2416_v35 }
 0x130   :  { %2287 = vmatpush3.bf16.msra.mxu0 %v2553_v42 }
 0x131   :  { %2288 = vmatprep.subr.bf16.mxu0 %v2416_v35 }
 0x133   :  { %2174 = vmatmul.mubr.f32.vlgmr.msra.gmra.mrb[12].mxu0 %v1048_v41 }
 0x134   :  { %2290 = vmatpush3.bf16.msra.mxu0 %v2571_v59  ;;  %2184 = vmatprep.mubr.msk.f32.mxu0 %vm2415_vm0, %v2414_v0 }
 0x135   :  { %2291 = vmatprep.subr.bf16.mxu0 %v2416_v35 }
 0x138   :  { %2293 = vmatpush3.bf16.msra.mxu0 %v2573_v60  ;;  %v1567_v60 = vsub.f32 %v1565_v50, %v1566_v55 }
 0x139   :  { %2294 = vmatprep.subr.bf16.mxu0 %v2416_v35 }
 0x13a   :  { %v1568_v1 = vand.u32 4294901760, %v1567_v60 }
 0x13b   :  { %2185 = vmatmul.mubr.f32.vlgmr.msra.gmra.mrb[12].mxu0 %v1046_v39 }
 0x13c   :  { %2296 = vmatpush3.bf16.msra.mxu0 %v2535_v32  ;;  %2195 = vmatprep.mubr.msk.f32.mxu0 %vm2415_vm0, %v2414_v0  ;;  %v1558_v32 = vsub.f32 %v1463_v45, %v1478_v47 }
 0x13d   :  { %2297 = vmatprep.subr.bf16.mxu0 %v2416_v35 }
 0x13e   :  { %v1559_v54 = vand.u32 4294901760, %v1558_v32  ;;  %v2313_v8 = vpack.c.bf16 %v1565_v50, %v1558_v32 }
 0x140   :  { %2299 = vmatpush3.bf16.msra.mxu0 %v2553_v42  ;;  %v1466_v42 = vld [vmem:[%s2668_s7 + $0x18] sm:$0xff]  ;;  %v1560_v59 = vsub.f32 %v1558_v32, %v1559_v54  ;;  %v2325_v10 = vpack.c.bf16 %v1566_v55, %v1559_v54 }
 0x141   :  { %v1487_v53 = vand.u32 4294901760, %v1466_v42 }
 0x142   :  { %v1561_v61 = vand.u32 4294901760, %v1560_v59 }
 0x143   :  { %2196 = vmatmul.mubr.f32.vlgmr.msra.gmra.mrb[12].mxu0 %v1046_v39  ;;  %v2304_v56 = vpack.c.bf16 %v1487_v53, %v1484_v52  ;;  %v1579_v58 = vsub.f32 %v1466_v42, %v1487_v53 }
 0x144   :  { %v2307_v4 = vpack.c.bf16 %v1568_v1, %v1561_v61 }
 0x145   :  { %2305 = vmatpush3.bf16.msra.mxu1 %v2304_v56  ;;  %v1580_v63 = vand.u32 4294901760, %v1579_v58  ;;  %v2316_v9 = vpack.c.bf16 %v1579_v58, %v1572_v57 }
 0x146   :  { %2306 = vmatprep.subr.bf16.mxu1 %v2416_v35 }
 0x147   :  { %v1581_v3 = vsub.f32 %v1579_v58, %v1580_v63  ;;  %v2328_v11 = vpack.c.bf16 %v1580_v63, %v1573_v62 }
 0x149   :  { %v1582_v6 = vand.u32 4294901760, %v1581_v3 }
 0x14b   :  { %v2310_v7 = vpack.c.bf16 %v1582_v6, %v1575_v5 }
 0x216   :  { %v1458_v13 = vpop.f32.mrb[12].mxu0 }
 0x217   :  { %v2336_v14 = vadd.f32 %v1986_v12, %v1458_v13  ;;  %v2197_v15 = vpop.f32.mrb[13].mxu0 }
 0x219   :  { %v1462_v16 = vmax.f32 %v2336_v14, 0.0 }
 0x21b   :  { %v1475_v17 = vsel %vm973_vm4, %v1462_v16, 0 }
 0x21c   :  { %v1546_v18 = vand.u32 4294901760, %v1475_v17 }
 0x21e   :  { %v1547_v19 = vsub.f32 %v1475_v17, %v1546_v18 }
 0x220   :  { %v1548_v20 = vand.u32 4294901760, %v1547_v19 }
 0x222   :  { %v1549_v21 = vsub.f32 %v1547_v19, %v1548_v20 }
 0x224   :  { %v1550_v22 = vand.u32 4294901760, %v1549_v21 }
 0x226   :  { %2207 = vmatmul.mubr.f32.vlgmr.msra.gmra.mrb[12].mxu1 %v1550_v22 }
 0x227   :  { %2308 = vmatpush3.bf16.msra.mxu1 %v2307_v4  ;;  %2217 = vmatprep.mubr.msk.f32.mxu1 %vm2415_vm0, %v2414_v0 }
 0x228   :  { %2309 = vmatprep.subr.bf16.mxu1 %v2416_v35 }
 0x22b   :  { %2311 = vmatpush3.bf16.msra.mxu1 %v2310_v7 }
 0x22c   :  { %2312 = vmatprep.subr.bf16.mxu1 %v2416_v35 }
 0x22e   :  { %2218 = vmatmul.mubr.f32.vlgmr.msra.gmra.mrb[12].mxu1 %v1546_v18 }
 0x22f   :  { %2314 = vmatpush3.bf16.msra.mxu1 %v2313_v8  ;;  %2228 = vmatprep.mubr.msk.f32.mxu1 %vm2415_vm0, %v2414_v0 }
 0x230   :  { %2315 = vmatprep.subr.bf16.mxu1 %v2416_v35 }
 0x233   :  { %2317 = vmatpush3.bf16.msra.mxu1 %v2316_v9 }
 0x234   :  { %2318 = vmatprep.subr.bf16.mxu1 %v2416_v35 }
 0x236   :  { %2229 = vmatmul.mubr.f32.vlgmr.msra.gmra.mrb[12].mxu1 %v1547_v19 }
 0x237   :  { %2320 = vmatpush3.bf16.msra.mxu1 %v2610_v49  ;;  %2239 = vmatprep.mubr.msk.f32.mxu1 %vm2415_vm0, %v2414_v0 }
 0x238   :  { %2321 = vmatprep.subr.bf16.mxu1 %v2416_v35 }
 0x23b   :  { %2323 = vmatpush3.bf16.msra.mxu1 %v2304_v56 }
 0x23c   :  { %2324 = vmatprep.subr.bf16.mxu1 %v2416_v35 }
 0x23e   :  { %2240 = vmatmul.mubr.f32.vlgmr.msra.gmra.mrb[12].mxu1 %v1548_v20 }
 0x23f   :  { %2326 = vmatpush3.bf16.msra.mxu1 %v2325_v10  ;;  %2250 = vmatprep.mubr.msk.f32.mxu1 %vm2415_vm0, %v2414_v0 }
 0x240   :  { %2327 = vmatprep.subr.bf16.mxu1 %v2416_v35 }
 0x243   :  { %2329 = vmatpush3.bf16.msra.mxu1 %v2328_v11 }
 0x244   :  { %2330 = vmatprep.subr.bf16.mxu1 %v2416_v35 }
 0x246   :  { %2251 = vmatmul.mubr.f32.vlgmr.msra.gmra.mrb[12].mxu1 %v1546_v18 }
 0x247   :  { %2332 = vmatpush3.bf16.msra.mxu1 %v2610_v49  ;;  %2261 = vmatprep.mubr.msk.f32.mxu1 %vm2415_vm0, %v2414_v0 }
 0x248   :  { %2333 = vmatprep.subr.bf16.mxu1 %v2416_v35 }
 0x24b   :  { %2335 = vmatpush3.bf16.msra.mxu1 %v2304_v56 }
 0x24e   :  { %2262 = vmatmul.mubr.f32.vlgmr.msra.gmra.mrb[12].mxu1 %v1546_v18 }
 0x321   :  { %v1958_v24 = vpop.f32.mrb[12].mxu1 }
 0x322   :  { %v2337_v25 = vadd.f32 %v1987_v23, %v1958_v24  ;;  %v2263_v26 = vpop.f32.mrb[13].mxu1 }
 0x324   :  { %v1965_v27 = vmul.f32 1.442695, %v2337_v25 }
 0x326   :  { %2363 = vpow2.f32 %v1965_v27 }
 0x330   :  { %v2364_v0 = vpop.eup %2363 }
 0x331   :  { %v1967_v35 = vsel %vm1964_vm5, %v2337_v25, %v2364_v0 }
 0x332   :  { %1969 = vst.msk [vmem:[#allocation5] sm:$0xff] %vm1968_vm6, %v1967_v35 }
 0x333   :  { %2398 = shalt.err (!%p2395_p12)
}
 0x334   :  { %s2399_s23 = scalar_lea.hbm %s2670_s9, 128 }
 0x335   :  { %p2400_p13 = scmp.ne.s32.totalorder %s2670_s9, %s2399_s23  ;;  %p2403_p0 = scmp.lt.u32.totalorder %s2399_s23, %s2670_s9 }
 0x337   :  { %p2405_p1 = pnand %p2403_p0, %p2400_p13 }
 0x339   :  { %2408 = shalt.err (!%p2405_p1)
}
 0x33a   :  { %1979 = dma.vmem_to_hbm [thread:$0]  %s1977_s21, 128, %s2670_s9, [#allocation4]  }
 0x33b   :  { %2411 = dma.done.wait [#allocation4], 128  }
 0x33c   :  { %2412 = vsyncadd [#allocation4], 4294967168 }
 0x33d   :  { %1983 = vsyncpa [#allocation3], 1 }
 0x33e   :  { %1984 = vsyncpa [#allocation4], 1 }

</bundles_post_ra>
